<compile_context>
chip_gen: v7x
topology: tpu7x:2x2x1
jax: 0.10.0
libtpu: 0.0.40
codegen_flags: <defaults>
</compile_context>

<pallas_src>
import functools

import jax
import jax.numpy as jnp
import numpy as np
from jax import lax
from jax.experimental import pallas as pl
from jax.experimental.pallas import tpu as pltpu

LANE = 128
SUBLANE = 8
NEG_BIG = -1e30  # finite "minus infinity" for masked softmax lanes


def _round_up(x, m):
    return ((x + m - 1) // m) * m


def _mlp_kernel(n_hidden, n_valid_out, *refs):
    """refs = (x_ref, w0, b0, w1, b1, ..., w_out, b_out, out_ref).

    x tile:   (TILE_B, D_in_pad)  f32
    weights:  (K_pad, N_pad)      bf16 (pre-transposed, VMEM-resident)
    biases:   (1, N_pad)          f32
    out tile: (TILE_B, D_out_pad) f32
    """
    x_ref = refs[0]
    out_ref = refs[-1]
    wb = refs[1:-1]

    h = x_ref[...]  # f32 activations
    # Hidden layers: Linear -> ReLU -> Dropout(identity in eval)
    for i in range(n_hidden):
        w = wb[2 * i][...]       # bf16 (K, N)
        b = wb[2 * i + 1][...]   # f32  (1, N)
        h = jnp.dot(h.astype(jnp.bfloat16), w,
                    preferred_element_type=jnp.float32) + b
        h = jnp.maximum(h, 0.0)
        # TODO(synk): nn.Dropout is identity in eval mode; training-mode dropout
        # would need pltpu.prng_seed + pltpu.stateful_bernoulli and cannot match
        # torch's RNG stream anyway.

    # Output layer
    w_out = wb[-2][...]
    b_out = wb[-1][...]
    logits = jnp.dot(h.astype(jnp.bfloat16), w_out,
                     preferred_element_type=jnp.float32) + b_out

    # Mask padded output lanes so they contribute nothing to log_softmax.
    col = lax.broadcasted_iota(jnp.int32, logits.shape, 1)
    logits = jnp.where(col < n_valid_out, logits, NEG_BIG)

    # log_softmax along dim=1 (lane axis)
    m = jnp.max(logits, axis=1, keepdims=True)
    shifted = logits - m
    lse = jnp.log(jnp.sum(jnp.exp(shifted), axis=1, keepdims=True))
    out_ref[...] = shifted - lse


def mlp_forward(x, params, *, max_tile_b=512):
    """params: list of (W, b) with W shaped (out_features, in_features) like torch."""
    B, d_in = x.shape
    n_hidden = len(params) - 1
    out_dim = params[-1][0].shape[0]

    # ---- pad feature dims to 128 lanes, batch to a sublane/tile multiple ----
    d_in_pad = _round_up(d_in, LANE)
    b_pad = _round_up(B, SUBLANE)
    tile_b = min(max_tile_b, b_pad)
    b_pad = _round_up(b_pad, tile_b)

    x_p = jnp.zeros((b_pad, d_in_pad), jnp.float32).at[:B, :d_in].set(x)

    flat_args = []
    layer_dims = []          # (K_pad, N_pad) per layer, for cost/vmem accounting
    prev_pad = d_in_pad
    for (w, b) in params:
        n, k = w.shape       # torch layout: (out_features, in_features)
        n_pad = _round_up(n, LANE)
        w_t = jnp.zeros((prev_pad, n_pad), jnp.float32).at[:k, :n].set(w.T)
        b_p = jnp.zeros((1, n_pad), jnp.float32).at[0, :n].set(b)
        flat_args.append(w_t.astype(jnp.bfloat16))   # bf16 for the MXU
        flat_args.append(b_p)                        # f32 bias, added post-accum
        layer_dims.append((prev_pad, n_pad))
        prev_pad = n_pad
    d_out_pad = prev_pad

    # ---- specs: x/out tiled over batch, params resident (constant index_map) ----
    grid = (b_pad // tile_b,)
    in_specs = [pl.BlockSpec((tile_b, d_in_pad), lambda i: (i, 0))]
    for a in flat_args:
        in_specs.append(pl.BlockSpec(a.shape, lambda i: (0, 0)))
    out_specs = pl.BlockSpec((tile_b, d_out_pad), lambda i: (i, 0))

    # ---- VMEM budget: 2x double-buffered x/out tiles + resident params ----
    param_bytes = sum(int(np.prod(a.shape)) * a.dtype.itemsize for a in flat_args)
    tile_bytes = 2 * tile_b * d_in_pad * 4 + 2 * tile_b * d_out_pad * 4
    act_bytes = tile_b * max(n for _, n in layer_dims) * 4
    vmem_limit = int(min(max(2 * (param_bytes + tile_bytes + act_bytes), 16 << 20),
                         48 << 20))

    flops = 2 * b_pad * sum(k * n for k, n in layer_dims)
    bytes_accessed = (x_p.size * 4 + param_bytes + b_pad * d_out_pad * 4)
    cost = pl.CostEstimate(flops=flops,
                           transcendentals=b_pad * d_out_pad,
                           bytes_accessed=bytes_accessed)

    kernel = functools.partial(_mlp_kernel, n_hidden, out_dim)

    out_p = pl.pallas_call(
        kernel,
        out_shape=jax.ShapeDtypeStruct((b_pad, d_out_pad), jnp.float32),
        grid=grid,
        in_specs=in_specs,
        out_specs=out_specs,
        compiler_params=pltpu.CompilerParams(
            dimension_semantics=("parallel",),
            vmem_limit_bytes=vmem_limit),
        cost_estimate=cost,
    )(x_p, *flat_args)

    return out_p[:B, :out_dim]


def init_params(key, input_size, hidden_layers, output_size):
    """Deterministic torch-style Linear init: U(-1/sqrt(fan_in), 1/sqrt(fan_in))."""
    sizes = [input_size] + list(hidden_layers) + [output_size]
    params = []
    for fan_in, fan_out in zip(sizes[:-1], sizes[1:]):
        key, kw, kb = jax.random.split(key, 3)
        bound = 1.0 / np.sqrt(fan_in)
        w = jax.random.uniform(kw, (fan_out, fan_in), jnp.float32, -bound, bound)
        b = jax.random.uniform(kb, (fan_out,), jnp.float32, -bound, bound)
        params.append((w, b))
    return params


def mlp_reference(x, params):
    """Pure-JAX reference (eval mode, f32) for a sanity check."""
    h = x
    for w, b in params[:-1]:
        h = jnp.maximum(h @ w.T + b, 0.0)
    w, b = params[-1]
    logits = h @ w.T + b
    return jax.nn.log_softmax(logits, axis=1)


if __name__ == "__main__":
    # Small shapes consistent with the module's forward (flat feature input).
    batch = 8
    input_size = 64
    hidden_layers = [32, 16]
    output_size = 10

    key = jax.random.PRNGKey(0)
    key_x, key_p = jax.random.split(key)
    x = jax.random.normal(key_x, (batch, input_size), jnp.float32)
    params = init_params(key_p, input_size, hidden_layers, output_size)

    out = mlp_forward(x, params)
    out = jax.block_until_ready(out)

    ref = mlp_reference(x, params)
    # Tolerance relaxed vs pure-f32: matmul inputs are bf16 (f32 accumulation).
    np.testing.assert_allclose(np.asarray(out), np.asarray(ref), atol=5e-2, rtol=5e-2)

    print("KERNEL_OK")
</pallas_src>

<mosaic_0001>
module attributes {stable_mosaic.version = 11 : i64} {
  func.func @_mlp_kernel(%arg0: i32, %arg1: memref<8x128xf32, #tpu.memory_space<vmem>>, %arg2: memref<128x128xbf16, #tpu.memory_space<vmem>>, %arg3: memref<1x128xf32, #tpu.memory_space<vmem>>, %arg4: memref<128x128xbf16, #tpu.memory_space<vmem>>, %arg5: memref<1x128xf32, #tpu.memory_space<vmem>>, %arg6: memref<128x128xbf16, #tpu.memory_space<vmem>>, %arg7: memref<1x128xf32, #tpu.memory_space<vmem>>, %arg8: memref<8x128xf32, #tpu.memory_space<vmem>>) attributes {dimension_semantics = [#tpu.dimension_semantics<parallel>], iteration_bounds = array<i64: 1>, scalar_prefetch = 0 : i64, scratch_operands = 0 : i64, tpu.core_type = #tpu.core_type<tc>, window_params = [{transform_indices = @transform_0, window_bounds = array<i64: 8, 128>}, {pipeline_mode = #tpu.pipeline_mode<synchronous>, transform_indices = @transform_1, window_bounds = array<i64: 128, 128>}, {pipeline_mode = #tpu.pipeline_mode<synchronous>, transform_indices = @transform_2, window_bounds = array<i64: 1, 128>}, {pipeline_mode = #tpu.pipeline_mode<synchronous>, transform_indices = @transform_3, window_bounds = array<i64: 128, 128>}, {pipeline_mode = #tpu.pipeline_mode<synchronous>, transform_indices = @transform_4, window_bounds = array<i64: 1, 128>}, {pipeline_mode = #tpu.pipeline_mode<synchronous>, transform_indices = @transform_5, window_bounds = array<i64: 128, 128>}, {pipeline_mode = #tpu.pipeline_mode<synchronous>, transform_indices = @transform_6, window_bounds = array<i64: 1, 128>}, {transform_indices = @transform_7, window_bounds = array<i64: 8, 128>}]} {
    %c0 = arith.constant 0 : index
    %c0_0 = arith.constant 0 : index
    %0 = vector.load %arg1[%c0, %c0_0] : memref<8x128xf32, #tpu.memory_space<vmem>>, vector<8x128xf32>
    %c0_1 = arith.constant 0 : index
    %c0_2 = arith.constant 0 : index
    %1 = vector.load %arg2[%c0_1, %c0_2] : memref<128x128xbf16, #tpu.memory_space<vmem>>, vector<128x128xbf16>
    %c0_3 = arith.constant 0 : index
    %c0_4 = arith.constant 0 : index
    %2 = vector.load %arg3[%c0_3, %c0_4] : memref<1x128xf32, #tpu.memory_space<vmem>>, vector<1x128xf32>
    %3 = arith.truncf %0 : vector<8x128xf32> to vector<8x128xbf16>
    %cst = arith.constant dense<0.000000e+00> : vector<8x128xf32>
    %4 = tpu.matmul %3, %1, %cst {dimension_numbers = #tpu.dot_dimension_numbers<[1], [0], [0], [1], [0, 0, 1, 1], [], []>} : vector<8x128xbf16>, vector<128x128xbf16>, vector<8x128xf32> -> vector<8x128xf32>
    %5 = vector.broadcast %2 : vector<1x128xf32> to vector<8x128xf32>
    %6 = arith.addf %4, %5 : vector<8x128xf32>
    %cst_5 = arith.constant 0.000000e+00 : f32
    %7 = vector.broadcast %cst_5 : f32 to vector<8x128xf32>
    %8 = arith.maximumf %6, %7 : vector<8x128xf32>
    %c0_6 = arith.constant 0 : index
    %c0_7 = arith.constant 0 : index
    %9 = vector.load %arg4[%c0_6, %c0_7] : memref<128x128xbf16, #tpu.memory_space<vmem>>, vector<128x128xbf16>
    %c0_8 = arith.constant 0 : index
    %c0_9 = arith.constant 0 : index
    %10 = vector.load %arg5[%c0_8, %c0_9] : memref<1x128xf32, #tpu.memory_space<vmem>>, vector<1x128xf32>
    %11 = arith.truncf %8 : vector<8x128xf32> to vector<8x128xbf16>
    %cst_10 = arith.constant dense<0.000000e+00> : vector<8x128xf32>
    %12 = tpu.matmul %11, %9, %cst_10 {dimension_numbers = #tpu.dot_dimension_numbers<[1], [0], [0], [1], [0, 0, 1, 1], [], []>} : vector<8x128xbf16>, vector<128x128xbf16>, vector<8x128xf32> -> vector<8x128xf32>
    %13 = vector.broadcast %10 : vector<1x128xf32> to vector<8x128xf32>
    %14 = arith.addf %12, %13 : vector<8x128xf32>
    %cst_11 = arith.constant 0.000000e+00 : f32
    %15 = vector.broadcast %cst_11 : f32 to vector<8x128xf32>
    %16 = arith.maximumf %14, %15 : vector<8x128xf32>
    %c0_12 = arith.constant 0 : index
    %c0_13 = arith.constant 0 : index
    %17 = vector.load %arg6[%c0_12, %c0_13] : memref<128x128xbf16, #tpu.memory_space<vmem>>, vector<128x128xbf16>
    %c0_14 = arith.constant 0 : index
    %c0_15 = arith.constant 0 : index
    %18 = vector.load %arg7[%c0_14, %c0_15] : memref<1x128xf32, #tpu.memory_space<vmem>>, vector<1x128xf32>
    %19 = arith.truncf %16 : vector<8x128xf32> to vector<8x128xbf16>
    %cst_16 = arith.constant dense<0.000000e+00> : vector<8x128xf32>
    %20 = tpu.matmul %19, %17, %cst_16 {dimension_numbers = #tpu.dot_dimension_numbers<[1], [0], [0], [1], [0, 0, 1, 1], [], []>} : vector<8x128xbf16>, vector<128x128xbf16>, vector<8x128xf32> -> vector<8x128xf32>
    %21 = vector.broadcast %18 : vector<1x128xf32> to vector<8x128xf32>
    %22 = arith.addf %20, %21 : vector<8x128xf32>
    %23 = tpu.iota {dimensions = array<i32: 1>} : vector<8x128xi32>
    %c10_i32 = arith.constant 10 : i32
    %24 = vector.broadcast %c10_i32 : i32 to vector<8x128xi32>
    %25 = arith.cmpi slt, %23, %24 : vector<8x128xi32>
    %cst_17 = arith.constant -1.000000e+30 : f32
    %26 = vector.broadcast %cst_17 : f32 to vector<8x128xf32>
    %27 = arith.select %25, %22, %26 : vector<8x128xi1>, vector<8x128xf32>
    %cst_18 = arith.constant dense<0xFF800000> : vector<8xf32>
    %28 = vector.multi_reduction <maximumf>, %27, %cst_18 [1] : vector<8x128xf32> to vector<8xf32>
    %29 = vector.shape_cast %28 : vector<8xf32> to vector<8x1xf32>
    %30 = vector.broadcast %29 : vector<8x1xf32> to vector<8x128xf32>
    %31 = arith.subf %27, %30 : vector<8x128xf32>
    %32 = math.exp %31 : vector<8x128xf32>
    %cst_19 = arith.constant dense<0.000000e+00> : vector<8xf32>
    %33 = vector.multi_reduction <add>, %32, %cst_19 [1] : vector<8x128xf32> to vector<8xf32>
    %34 = vector.shape_cast %33 : vector<8xf32> to vector<8x1xf32>
    %35 = math.log %34 : vector<8x1xf32>
    %36 = vector.broadcast %35 : vector<8x1xf32> to vector<8x128xf32>
    %37 = arith.subf %31, %36 : vector<8x128xf32>
    %c0_20 = arith.constant 0 : index
    %c0_21 = arith.constant 0 : index
    %38 = vector.load %arg8[%c0_20, %c0_21] : memref<8x128xf32, #tpu.memory_space<vmem>>, vector<8x128xf32>
    tpu.vector_store %arg8[%c0_20, %c0_21], %37 {strides = array<i32>} : memref<8x128xf32, #tpu.memory_space<vmem>>, vector<8x128xf32>,
    return
  }
  func.func @transform_0(%arg0: i32) -> (i32, i32) {
    %c0_i32 = arith.constant 0 : i32
    %c0_i32_0 = arith.constant 0 : i32
    return %arg0, %c0_i32 : i32, i32
  }
  func.func @transform_1(%arg0: i32) -> (i32, i32) {
    %c0_i32 = arith.constant 0 : i32
    %c0_i32_0 = arith.constant 0 : i32
    %c0_i32_1 = arith.constant 0 : i32
    return %c0_i32, %c0_i32_0 : i32, i32
  }
  func.func @transform_2(%arg0: i32) -> (i32, i32) {
    %c0_i32 = arith.constant 0 : i32
    %c0_i32_0 = arith.constant 0 : i32
    %c0_i32_1 = arith.constant 0 : i32
    return %c0_i32, %c0_i32_0 : i32, i32
  }
  func.func @transform_3(%arg0: i32) -> (i32, i32) {
    %c0_i32 = arith.constant 0 : i32
    %c0_i32_0 = arith.constant 0 : i32
    %c0_i32_1 = arith.constant 0 : i32
    return %c0_i32, %c0_i32_0 : i32, i32
  }
  func.func @transform_4(%arg0: i32) -> (i32, i32) {
    %c0_i32 = arith.constant 0 : i32
    %c0_i32_0 = arith.constant 0 : i32
    %c0_i32_1 = arith.constant 0 : i32
    return %c0_i32, %c0_i32_0 : i32, i32
  }
  func.func @transform_5(%arg0: i32) -> (i32, i32) {
    %c0_i32 = arith.constant 0 : i32
    %c0_i32_0 = arith.constant 0 : i32
    %c0_i32_1 = arith.constant 0 : i32
    return %c0_i32, %c0_i32_0 : i32, i32
  }
  func.func @transform_6(%arg0: i32) -> (i32, i32) {
    %c0_i32 = arith.constant 0 : i32
    %c0_i32_0 = arith.constant 0 : i32
    %c0_i32_1 = arith.constant 0 : i32
    return %c0_i32, %c0_i32_0 : i32, i32
  }
  func.func @transform_7(%arg0: i32) -> (i32, i32) {
    %c0_i32 = arith.constant 0 : i32
    %c0_i32_0 = arith.constant 0 : i32
    return %arg0, %c0_i32 : i32, i32
  }
}

</mosaic_0001>

<bundles_post_ra>
// kernel: tpu_custom_call.1
= control target key start
LH: loop header
LB: loop body
LE: loop exit
PB: predicated region body
PF: predicated region fallthrough
CT: control target
= control target key end

     0   :  { %12 = vsyncpa [#allocation3], 0  ;;  %s878_s0 = inlined_call_operand.hbm [shape: f32[8,128], index: 0, kind: input, shape index: {}]   ;;  %s879_s1 = inlined_call_operand.hbm [shape: bf16[128,128], index: 1, kind: input, shape index: {}]   ;;  %s880_s2 = inlined_call_operand.vmem [shape: f32[1,128], index: 2, kind: input, shape index: {}]   ;;  %s881_s3 = inlined_call_operand.hbm [shape: bf16[128,128], index: 3, kind: input, shape index: {}]   ;;  %s882_s4 = inlined_call_operand.vmem [shape: f32[1,128], index: 4, kind: input, shape index: {}]   ;;  %s883_s5 = inlined_call_operand.hbm [shape: bf16[128,128], index: 5, kind: input, shape index: {}]   ;;  %s884_s6 = inlined_call_operand.vmem [shape: f32[1,128], index: 6, kind: input, shape index: {}]   ;;  %s885_s7 = inlined_call_operand.hbm [shape: f32[8,128], index: 7, kind: output, shape index: {}]  }
   0x1   :  { %13 = vsyncpa [#allocation6], 0 }
   0x2   :  { %14 = vsyncpa [#allocation9], 0 }
   0x3   :  { %15 = vsyncpa [#allocation4], 0  ;;  %s721_s24 = smov [#allocation5]   ;;  %s603_s28 = scalar_lea.hbm %s879_s1, 1024 }
   0x4   :  { %s31_s25 = sshll.u32 %s721_s24, 4  ;;  %p604_p0 = scmp.ne.s32.totalorder %s879_s1, %s603_s28  ;;  %s32_s25 = int_to_ptr.vmem [resolvable:$true] %s31_s25 }
   0x5   :  { %p607_p1 = scmp.lt.u32.totalorder %s603_s28, %s879_s1 }
   0x7   :  { %p609_p2 = pnand %p607_p1, %p604_p0 }
   0x9   :  { %612 = shalt.err (!%p609_p2)
}
   0xa   :  { %s613_s10 = scalar_lea.vmem %s32_s25, 1024  ;;  %p618_p4 = scmp.lt.s32.totalorder %s32_s25, %s32_s25 }
   0xb   :  { %p614_p3 = scmp.ne.s32.totalorder %s32_s25, %s613_s10  ;;  %p619_p5 = scmp.lt.s32.totalorder %s613_s10, %s613_s10 }
   0xd   :  { %p620_p6 = por %p619_p5, %p618_p4 }
   0xf   :  { %p621_p7 = pnand %p620_p6, %p614_p3 }
  0x11   :  { %624 = shalt.err (!%p621_p7)
}
  0x12   :  { %s722_s11 = smov 64   ;;  %s723_s12 = smov 4  }
  0x13   :  { %37 = dma.hbm_to_vmem [thread:$0]  %s879_s1, 1024, %s32_s25, [#allocation6], %s722_s11, %s722_s11, %s723_s12  }
  0x14   :  { %s724_s15 = smov [#allocation2]   ;;  %s725_s17 = smov [#allocation7]  }
  0x15   :  { %s22_s16 = sshll.u32 %s724_s15, 4  ;;  %s45_s18 = sshll.u32 %s725_s17, 4  ;;  %s23_s16 = int_to_ptr.vmem [resolvable:$true] %s22_s16  ;;  %s46_s18 = int_to_ptr.vmem [resolvable:$true] %s45_s18 }
  0x16   :  { %s625_s21 = scalar_lea.hbm %s878_s0, 128 }
  0x17   :  { %p626_p8 = scmp.ne.s32.totalorder %s878_s0, %s625_s21  ;;  %p629_p9 = scmp.lt.u32.totalorder %s625_s21, %s878_s0 }
  0x19   :  { %p631_p10 = pnand %p629_p9, %p626_p8 }
  0x1b   :  { %634 = shalt.err (!%p631_p10)
}
  0x1c   :  { %s635_s1 = scalar_lea.vmem %s23_s16, 128  ;;  %p640_p12 = scmp.lt.s32.totalorder %s23_s16, %s23_s16 }
  0x1d   :  { %p636_p11 = scmp.ne.s32.totalorder %s23_s16, %s635_s1  ;;  %p641_p13 = scmp.lt.s32.totalorder %s635_s1, %s635_s1 }
  0x1f   :  { %p642_p0 = por %p641_p13, %p640_p12 }
  0x21   :  { %p643_p1 = pnand %p642_p0, %p636_p11 }
  0x23   :  { %646 = shalt.err (!%p643_p1)
}
  0x24   :  { %25 = dma.hbm_to_vmem [thread:$0]  %s878_s0, 128, %s23_s16, [#allocation3]  }
  0x25   :  { %s647_s30 = scalar_lea.hbm %s881_s3, 1024 }
  0x26   :  { %p648_p2 = scmp.ne.s32.totalorder %s881_s3, %s647_s30  ;;  %p651_p3 = scmp.lt.u32.totalorder %s647_s30, %s881_s3 }
  0x28   :  { %p653_p4 = pnand %p651_p3, %p648_p2 }
  0x2a   :  { %656 = shalt.err (!%p653_p4)
}
  0x2b   :  { %s657_s14 = scalar_lea.vmem %s46_s18, 1024  ;;  %p662_p6 = scmp.lt.s32.totalorder %s46_s18, %s46_s18 }
  0x2c   :  { %p658_p5 = scmp.ne.s32.totalorder %s46_s18, %s657_s14  ;;  %p663_p7 = scmp.lt.s32.totalorder %s657_s14, %s657_s14 }
  0x2e   :  { %p664_p8 = por %p663_p7, %p662_p6 }
  0x30   :  { %p665_p9 = pnand %p664_p8, %p658_p5 }
  0x32   :  { %668 = shalt.err (!%p665_p9)
}
  0x33   :  { %51 = dma.hbm_to_vmem [thread:$0]  %s881_s3, 1024, %s46_s18, [#allocation6], %s722_s11, %s722_s11, %s723_s12  }
  0x34   :  { %s726_s16 = smov [#allocation8]   ;;  %s669_s21 = scalar_lea.hbm %s883_s5, 1024 }
  0x35   :  { %s59_s17 = sshll.u32 %s726_s16, 4  ;;  %p670_p10 = scmp.ne.s32.totalorder %s883_s5, %s669_s21  ;;  %s60_s17 = int_to_ptr.vmem [resolvable:$true] %s59_s17 }
  0x36   :  { %p673_p11 = scmp.lt.u32.totalorder %s669_s21, %s883_s5 }
  0x38   :  { %p675_p12 = pnand %p673_p11, %p670_p10 }
  0x3a   :  { %678 = shalt.err (!%p675_p12)
}
  0x3b   :  { %s679_s1 = scalar_lea.vmem %s60_s17, 1024  ;;  %p684_p0 = scmp.lt.s32.totalorder %s60_s17, %s60_s17 }
  0x3c   :  { %p680_p13 = scmp.ne.s32.totalorder %s60_s17, %s679_s1  ;;  %p685_p1 = scmp.lt.s32.totalorder %s679_s1, %s679_s1 }
  0x3e   :  { %p686_p2 = por %p685_p1, %p684_p0 }
  0x40   :  { %p687_p3 = pnand %p686_p2, %p680_p13 }
  0x42   :  { %690 = shalt.err (!%p687_p3)
}
  0x43   :  { %65 = dma.hbm_to_vmem [thread:$0]  %s883_s5, 1024, %s60_s17, [#allocation9], %s722_s11, %s722_s11, %s723_s12  }
  0x44   :  { %713 = dma.done.wait [#allocation3], 128  }
  0x45   :  { %714 = vsyncadd [#allocation3], 4294967168 }
  0x46   :  { %715 = dma.done.wait [#allocation6], 2048  }
  0x47   :  { %716 = vsyncadd [#allocation6], 4294965248 }
  0x48   :  { %717 = dma.done.wait [#allocation9], 1024  }
  0x49   :  { %718 = vsyncadd [#allocation9], 4294966272  ;;  %v727_v0 = vmov 0.0   ;;  %vm728_vm0 = vmmov 0   ;;  %v575_v1 = vld [vmem:[#allocation5] sm:$0xff]   ;;  %v576_v2 = vld [vmem:[#allocation5 + $0x8] sm:$0xff]   ;;  %v420_v43 = vlaneseq }
  0x4a   :  { %506 = vmatprep.subr.bf16.mxu0 %v727_v0  ;;  %522 = vmatprep.mubr.msk.bf16.mxu0 %vm728_vm0, %v727_v0  ;;  %v577_v3 = vld [vmem:[#allocation5 + $0x10] sm:$0xff]   ;;  %v583_v4 = vld [vmem:[#allocation7] sm:$0xff]   ;;  %v578_v5 = vld [vmem:[#allocation5 + $0x18] sm:$0xff]  }
  0x4b   :  { %526 = vmatprep.subr.bf16.mxu1 %v727_v0  ;;  %542 = vmatprep.mubr.msk.bf16.mxu1 %vm728_vm0, %v727_v0  ;;  %v584_v6 = vld [vmem:[#allocation7 + $0x8] sm:$0xff]   ;;  %v579_v7 = vld [vmem:[#allocation5 + $0x20] sm:$0xff]   ;;  %v585_v8 = vld [vmem:[#allocation7 + $0x10] sm:$0xff]   ;;  %v421_v44 = vand.u32 127, %v420_v43 }
  0x4c   :  { %507 = vmatpush3.bf16.msra.mxu0 %v575_v1  ;;  %527 = vmatpush3.bf16.msra.mxu1 %v583_v4  ;;  %v580_v9 = vld [vmem:[#allocation5 + $0x28] sm:$0xff]   ;;  %v586_v10 = vld [vmem:[#allocation7 + $0x18] sm:$0xff]   ;;  %v581_v11 = vld [vmem:[#allocation5 + $0x30] sm:$0xff]  }
  0x4d   :  { %508 = vmatprep.subr.bf16.mxu0 %v727_v0  ;;  %528 = vmatprep.subr.bf16.mxu1 %v727_v0  ;;  %v587_v12 = vld [vmem:[#allocation7 + $0x20] sm:$0xff]   ;;  %v582_v13 = vld [vmem:[#allocation5 + $0x38] sm:$0xff]   ;;  %v588_v15 = vld [vmem:[#allocation7 + $0x28] sm:$0xff]   ;;  %vm422_vm1 = vcmp.lt.s32.totalorder %v421_v44, 10 }
  0x4e   :  { %v81_v14 = vld [vmem:[#allocation2] sm:$0xff]  ;;  %v589_v17 = vld [vmem:[#allocation7 + $0x30] sm:$0xff]   ;;  %v591_v19 = vld [vmem:[#allocation8] sm:$0xff]  }
  0x4f   :  { %v99_v16 = vpack.c.bf16 %v81_v14, %v81_v14  ;;  %v590_v18 = vld [vmem:[#allocation7 + $0x38] sm:$0xff]   ;;  %v592_v20 = vld [vmem:[#allocation8 + $0x8] sm:$0xff]   ;;  %v593_v21 = vld [vmem:[#allocation8 + $0x10] sm:$0xff]  }
  0x50   :  { %509 = vmatpush3.bf16.msra.mxu0 %v576_v2  ;;  %529 = vmatpush3.bf16.msra.mxu1 %v584_v6  ;;  %v594_v22 = vld [vmem:[#allocation8 + $0x18] sm:$0xff]   ;;  %v595_v23 = vld [vmem:[#allocation8 + $0x20] sm:$0xff]   ;;  %v596_v24 = vld [vmem:[#allocation8 + $0x28] sm:$0xff]  }
  0x51   :  { %510 = vmatprep.subr.bf16.mxu0 %v727_v0  ;;  %530 = vmatprep.subr.bf16.mxu1 %v727_v0  ;;  %v452_v25 = vld [vmem:[%s880_s2] ss:$0 sm:$0xff]  ;;  %v597_v33 = vld [vmem:[#allocation8 + $0x30] sm:$0xff]  }
  0x52   :  { %v598_v34 = vld [vmem:[#allocation8 + $0x38] sm:$0xff]  }
  0x53   :  { %v461_v35 = vld [vmem:[%s882_s4] ss:$0 sm:$0xff]  ;;  %s729_s4 = smov [#allocation10]  }
  0x54   :  { %511 = vmatpush3.bf16.msra.mxu0 %v577_v3  ;;  %531 = vmatpush3.bf16.msra.mxu1 %v585_v8  ;;  %v470_v45 = vld [vmem:[%s884_s6] ss:$0 sm:$0xff]  ;;  %s441_s28 = sshll.u32 %s729_s4, 4  ;;  %s442_s28 = int_to_ptr.vmem [resolvable:$true] %s441_s28 }
  0x55   :  { %512 = vmatprep.subr.bf16.mxu0 %v727_v0  ;;  %532 = vmatprep.subr.bf16.mxu1 %v727_v0  ;;  %s691_s6 = scalar_lea.vmem %s442_s28, 128  ;;  %p696_p5 = scmp.lt.s32.totalorder %s442_s28, %s442_s28 }
  0x56   :  { %p692_p4 = scmp.ne.s32.totalorder %s442_s28, %s691_s6  ;;  %p697_p6 = scmp.lt.s32.totalorder %s691_s6, %s691_s6 }
  0x58   :  { %513 = vmatpush3.bf16.msra.mxu0 %v578_v5  ;;  %533 = vmatpush3.bf16.msra.mxu1 %v586_v10  ;;  %p698_p7 = por %p697_p6, %p696_p5 }
  0x59   :  { %514 = vmatprep.subr.bf16.mxu0 %v727_v0  ;;  %534 = vmatprep.subr.bf16.mxu1 %v727_v0 }
  0x5a   :  { %p699_p8 = pnand %p698_p7, %p692_p4 }
  0x5c   :  { %515 = vmatpush3.bf16.msra.mxu0 %v579_v7  ;;  %535 = vmatpush3.bf16.msra.mxu1 %v587_v12 }
  0x5d   :  { %516 = vmatprep.subr.bf16.mxu0 %v727_v0  ;;  %536 = vmatprep.subr.bf16.mxu1 %v727_v0 }
  0x60   :  { %517 = vmatpush3.bf16.msra.mxu0 %v580_v9  ;;  %537 = vmatpush3.bf16.msra.mxu1 %v588_v15 }
  0x61   :  { %518 = vmatprep.subr.bf16.mxu0 %v727_v0  ;;  %538 = vmatprep.subr.bf16.mxu1 %v727_v0 }
  0x64   :  { %519 = vmatpush3.bf16.msra.mxu0 %v581_v11  ;;  %539 = vmatpush3.bf16.msra.mxu1 %v589_v17 }
  0x65   :  { %520 = vmatprep.subr.bf16.mxu0 %v727_v0  ;;  %540 = vmatprep.subr.bf16.mxu1 %v727_v0 }
  0x68   :  { %521 = vmatpush3.bf16.msra.mxu0 %v582_v13  ;;  %541 = vmatpush3.bf16.msra.mxu1 %v590_v18 }
  0x69   :  { %546 = vmatprep.subr.bf16.mxu0 %v727_v0 }
  0x6b   :  { %523 = vmatmul.mubr.bf16.vlgmr.msra.gmra.mrb[0].mxu0 %v99_v16 }
  0x6c   :  { %562 = vmatprep.mubr.msk.bf16.mxu0 %vm728_vm0, %v727_v0  ;;  %547 = vmatpush3.bf16.msra.mxu0 %v591_v19 }
  0x6d   :  { %548 = vmatprep.subr.bf16.mxu0 %v727_v0 }
  0x70   :  { %549 = vmatpush3.bf16.msra.mxu0 %v592_v20 }
  0x71   :  { %550 = vmatprep.subr.bf16.mxu0 %v727_v0 }
  0x74   :  { %551 = vmatpush3.bf16.msra.mxu0 %v593_v21 }
  0x75   :  { %552 = vmatprep.subr.bf16.mxu0 %v727_v0 }
  0x78   :  { %553 = vmatpush3.bf16.msra.mxu0 %v594_v22 }
  0x79   :  { %554 = vmatprep.subr.bf16.mxu0 %v727_v0 }
  0x7c   :  { %555 = vmatpush3.bf16.msra.mxu0 %v595_v23 }
  0x7d   :  { %556 = vmatprep.subr.bf16.mxu0 %v727_v0 }
  0x80   :  { %557 = vmatpush3.bf16.msra.mxu0 %v596_v24 }
  0x81   :  { %558 = vmatprep.subr.bf16.mxu0 %v727_v0 }
  0x84   :  { %559 = vmatpush3.bf16.msra.mxu0 %v597_v33 }
  0x85   :  { %560 = vmatprep.subr.bf16.mxu0 %v727_v0 }
  0x88   :  { %561 = vmatpush3.bf16.msra.mxu0 %v598_v34 }
 0x13e   :  { %v188_v26 = vpop.f32.mrb[0].mxu0 }
 0x13f   :  { %v189_v27 = vadd.f32 %v452_v25, %v188_v26  ;;  %v524_v28 = vpop.f32.mrb[1].mxu0 }
 0x140   :  { %v191_v29 = vpop.f32.mrb[2].mxu0 }
 0x141   :  { %v194_v30 = vmax.f32 %v189_v27, 0.0  ;;  %v525_v31 = vpop.f32.mrb[3].mxu0 }
 0x143   :  { %v212_v32 = vpack.c.bf16 %v194_v30, %v194_v30 }
 0x145   :  { %543 = vmatmul.mubr.bf16.vlgmr.msra.gmra.mrb[0].mxu1 %v212_v32 }
 0x218   :  { %v301_v36 = vpop.f32.mrb[0].mxu1 }
 0x219   :  { %v302_v37 = vadd.f32 %v461_v35, %v301_v36  ;;  %v544_v38 = vpop.f32.mrb[1].mxu1 }
 0x21a   :  { %v304_v39 = vpop.f32.mrb[2].mxu1 }
 0x21b   :  { %v307_v40 = vmax.f32 %v302_v37, 0.0  ;;  %v545_v41 = vpop.f32.mrb[3].mxu1 }
 0x21d   :  { %v325_v42 = vpack.c.bf16 %v307_v40, %v307_v40 }
 0x21f   :  { %563 = vmatmul.mubr.bf16.vlgmr.msra.gmra.mrb[4].mxu0 %v325_v42 }
 0x2f2   :  { %v414_v46 = vpop.f32.mrb[4].mxu0 }
 0x2f3   :  { %v415_v47 = vadd.f32 %v470_v45, %v414_v46  ;;  %v564_v48 = vpop.f32.mrb[5].mxu0 }
 0x2f4   :  { %v417_v49 = vpop.f32.mrb[6].mxu0 }
 0x2f5   :  { %v565_v50 = vpop.f32.mrb[7].mxu0  ;;  %v423_v51 = vsel %vm422_vm1, %v415_v47, -1e+30 }
 0x2f6   :  { %424 = vmax.xlane.f32.xlu0 %v423_v51 }
 0x383   :  { %v425_v52 = vpop.xlane.xlu0 %424 }
 0x384   :  { %v426_v53 = vsub.f32 %v423_v51, %v425_v52 }
 0x386   :  { %v427_v54 = vmul.f32 1.442695, %v426_v53 }
 0x388   :  { %599 = vpow2.f32 %v427_v54 }
 0x392   :  { %v600_v55 = vpop.eup %599 }
 0x393   :  { %429 = vadd.xlane.f32.xlu0 %v600_v55 }
 0x420   :  { %v430_v56 = vpop.xlane.xlu0 %429 }
 0x421   :  { %601 = vlog2.f32 %v430_v56 }
 0x42b   :  { %v602_v57 = vpop.eup %601 }
 0x42c   :  { %v432_v58 = vmul.f32 0.6931472, %v602_v57 }
 0x42e   :  { %v433_v59 = vsub.f32 %v426_v53, %v432_v58 }
 0x430   :  { %434 = vst [vmem:[#allocation10] sm:$0xff] %v433_v59 }
 0x431   :  { %702 = shalt.err (!%p699_p8)
}
 0x432   :  { %s703_s8 = scalar_lea.hbm %s885_s7, 128 }
 0x433   :  { %p704_p9 = scmp.ne.s32.totalorder %s885_s7, %s703_s8  ;;  %p707_p10 = scmp.lt.u32.totalorder %s703_s8, %s885_s7 }
 0x435   :  { %p709_p11 = pnand %p707_p10, %p704_p9 }
 0x437   :  { %712 = shalt.err (!%p709_p11)
}
 0x438   :  { %444 = dma.vmem_to_hbm [thread:$0]  %s442_s28, 128, %s885_s7, [#allocation4]  }
 0x439   :  { %719 = dma.done.wait [#allocation4], 128  }
 0x43a   :  { %720 = vsyncadd [#allocation4], 4294967168 }
 0x43b   :  { %448 = vsyncpa [#allocation3], 1 }
 0x43c   :  { %449 = vsyncpa [#allocation6], 1 }
 0x43d   :  { %450 = vsyncpa [#allocation9], 1 }
 0x43e   :  { %451 = vsyncpa [#allocation4], 1 }

</bundles_post_ra>
